<compile_context>
chip_gen: v5e
topology: v5e:2x2
jax: 0.10.0
libtpu: 0.0.40
codegen_flags: <defaults>
</compile_context>

<pallas_src>
import jax
import jax.numpy as jnp
from jax.experimental import pallas as pl
from jax.experimental.pallas import tpu as pltpu


def _round_up(x, m):
    return (x + m - 1) // m * m


def _link_rep_kernel_merged(src_ref, dst_ref, w1_ref, b1_ref, w2_ref, b2_ref,
                            out_ref):
    # Elementwise work in f32 (v5e VPU has no bf16).
    src = src_ref[...].astype(jnp.float32)
    dst = dst_ref[...].astype(jnp.float32)

    w1 = w1_ref[...]                      # [3E, H_pad]
    w2 = w2_ref[...]                      # [H_pad, O_out]
    mx = w1.dtype                         # MXU operand dtype (f32 or bf16)

    # One lane-concatenated operand -> one layer-1 MXU dot (K = 3E instead of
    # three K = E dots). Equivalent to concat([src, dst, diff, prod]) @ W1 after
    # the wrapper's exact weight folding.
    x = jnp.concatenate([src, dst, src * dst], axis=-1)        # [TB, 3E]
    h = jnp.dot(x.astype(mx), w1, preferred_element_type=jnp.float32)
    h = jnp.maximum(h + b1_ref[...].astype(jnp.float32), 0.0)  # ReLU in f32

    # Dropout: identity (eval / inference mode).

    o = jnp.dot(h.astype(mx), w2, preferred_element_type=jnp.float32)
    o = jnp.maximum(o + b2_ref[...].astype(jnp.float32), 0.0)  # ReLU in f32
    out_ref[...] = o.astype(out_ref.dtype)


def _link_rep_kernel_split(src_ref, dst_ref, w1s_ref, w1d_ref, w1p_ref, b1_ref,
                           w2_ref, b2_ref, out_ref):
    # Large-E path: three separate dots (each K = E already fills MXU K-tiles).
    src = src_ref[...].astype(jnp.float32)
    dst = dst_ref[...].astype(jnp.float32)
    prod = src * dst

    w1s = w1s_ref[...]
    w1d = w1d_ref[...]
    w1p = w1p_ref[...]
    w2 = w2_ref[...]
    mx = w1s.dtype

    h = jnp.dot(src.astype(mx), w1s, preferred_element_type=jnp.float32)
    h = h + jnp.dot(dst.astype(mx), w1d, preferred_element_type=jnp.float32)
    h = h + jnp.dot(prod.astype(mx), w1p, preferred_element_type=jnp.float32)
    h = jnp.maximum(h + b1_ref[...].astype(jnp.float32), 0.0)

    # Dropout: identity (eval / inference mode).

    o = jnp.dot(h.astype(mx), w2, preferred_element_type=jnp.float32)
    o = jnp.maximum(o + b2_ref[...].astype(jnp.float32), 0.0)
    out_ref[...] = o.astype(out_ref.dtype)


def link_representation(src_emb, dst_emb, w1, b1, w2, b2, *,
                        block_batch=1024, matmul_dtype=None,
                        merge_layer1=None, vmem_budget_bytes=48 << 20):
    """src_emb, dst_emb: [B, E] float32. w1: [4E, H], b1: [H], w2: [H, O], b2: [O].

    Returns [B, O].  `matmul_dtype=jnp.bfloat16` casts only the MXU operands
    (f32 accumulation and f32 bias/ReLU are kept).
    """
    B, E = src_emb.shape
    H = w1.shape[1]
    O = w2.shape[1]
    assert w1.shape == (4 * E, H)
    assert b1.shape == (H,)
    assert w2.shape == (H, O)
    assert b2.shape == (O,)
    out_dtype = src_emb.dtype

    # --- one-time exact weight folding: removes the 4-way concat / diff ---
    #   concat([s, d, s-d, s*d]) @ W1 == s@(W1a+W1c) + d@(W1b-W1c) + (s*d)@W1d
    w1_src = w1[:E] + w1[2 * E:3 * E]
    w1_dst = w1[E:2 * E] - w1[2 * E:3 * E]
    w1_prod = w1[3 * E:]

    # --- lane-dense hidden: pad H to a multiple of 128 (h lives only in VMEM;
    #     padded b1 columns are 0 -> relu(0)=0 -> padded W2 rows are inert) ---
    H_pad = _round_up(H, 128)
    if H_pad != H:
        pad_h = H_pad - H
        w1_src = jnp.pad(w1_src, ((0, 0), (0, pad_h)))
        w1_dst = jnp.pad(w1_dst, ((0, 0), (0, pad_h)))
        w1_prod = jnp.pad(w1_prod, ((0, 0), (0, pad_h)))
        b1 = jnp.pad(b1, (0, pad_h))
        w2 = jnp.pad(w2, ((0, pad_h), (0, 0)))

    # --- conditional output padding: only when it costs <= 25% extra writeback ---
    O_pad = _round_up(O, 128)
    pad_output = (O_pad != O) and (O_pad - O) * 4 <= O
    O_out = O_pad if pad_output else O
    if pad_output:
        w2 = jnp.pad(w2, ((0, 0), (0, O_pad - O)))
        b2 = jnp.pad(b2, (0, O_pad - O))
    b1 = b1.reshape(1, H_pad)
    b2 = b2.reshape(1, O_out)

    # --- layer-1 merge (single K=3E dot) for small E ---
    if merge_layer1 is None:
        merge_layer1 = E <= 128
    if merge_layer1:
        w1_fold = jnp.concatenate([w1_src, w1_dst, w1_prod], axis=0)  # [3E, H_pad]

    # --- optional bf16 MXU operands (fold/pad done in f32 first) ---
    if matmul_dtype is not None:
        if merge_layer1:
            w1_fold = w1_fold.astype(matmul_dtype)
        else:
            w1_src = w1_src.astype(matmul_dtype)
            w1_dst = w1_dst.astype(matmul_dtype)
            w1_prod = w1_prod.astype(matmul_dtype)
        w2 = w2.astype(matmul_dtype)
    w_bytes = jnp.dtype(matmul_dtype or jnp.float32).itemsize
    out_bytes = jnp.dtype(out_dtype).itemsize

    # --- batch tile selection ---
    # Sublane-aligned; aim for >= 2 grid steps when B > 8 so the "parallel" axis
    # can shard across both TensorCores on v7x; shrink to fit the VMEM budget.
    if B <= 8:
        TB = B                                              # block == full dim
    else:
        TB = min(block_batch, _round_up(pl.cdiv(B, 2), 8))

    def vmem_estimate(tb):
        weights = (3 * E * H_pad + H_pad * O_out) * w_bytes + (H_pad + O_out) * 4
        streamed = 2 * (2 * tb * E * 4) + 2 * tb * O_out * out_bytes
        interm = tb * (3 * E + 2 * H_pad + O_out) * 4
        return weights + streamed + interm

    while TB > 8 and vmem_estimate(TB) > vmem_budget_bytes:
        TB = _round_up(TB // 2, 8)

    grid = (pl.cdiv(B, TB),)   # ragged last block: OOB rows read garbage, writes dropped

    batch_spec = pl.BlockSpec((TB, E), lambda i: (i, 0))
    # Constant index map + single buffer: fetched once, VMEM-resident, no wasted
    # second pipeline buffer.
    resident = lambda shape: pl.BlockSpec(shape, lambda i: (0, 0),
                                          pipeline_mode=pl.Buffered(1))

    if merge_layer1:
        kernel = _link_rep_kernel_merged
        w1_specs = [resident((3 * E, H_pad))]
        w1_args = (w1_fold,)
    else:
        kernel = _link_rep_kernel_split
        w1_specs = [resident((E, H_pad))] * 3
        w1_args = (w1_src, w1_dst, w1_prod)

    vmem_limit = int(min(max(2 * vmem_estimate(TB), 32 << 20), 64 << 20))

    out = pl.pallas_call(
        kernel,
        out_shape=jax.ShapeDtypeStruct((B, O_out), out_dtype),
        grid_spec=pltpu.PrefetchScalarGridSpec(
            num_scalar_prefetch=0,
            grid=grid,
            in_specs=[
                batch_spec,               # src   [TB, E]
                batch_spec,               # dst   [TB, E]
                *w1_specs,                # W1 (folded, single or split)
                resident((1, H_pad)),     # b1
                resident((H_pad, O_out)), # W2
                resident((1, O_out)),     # b2
            ],
            out_specs=pl.BlockSpec((TB, O_out), lambda i: (i, 0)),
        ),
        compiler_params=pltpu.CompilerParams(
            dimension_semantics=("parallel",),   # batch tiles shard across TCs (v7x)
            vmem_limit_bytes=vmem_limit),
    )(src_emb, dst_emb, *w1_args, b1, w2, b2)

    return out[:, :O] if pad_output else out


if __name__ == "__main__":
    # Small, module-consistent shapes.
    batch = 8
    embed_dim = 32
    fusion_hidden_dim = 64
    fusion_output_dim = 32

    key = jax.random.PRNGKey(0)
    k_src, k_dst, k_w1, k_b1, k_w2, k_b2 = jax.random.split(key, 6)

    src_emb = jax.random.normal(k_src, (batch, embed_dim), dtype=jnp.float32)
    dst_emb = jax.random.normal(k_dst, (batch, embed_dim), dtype=jnp.float32)

    # Deterministic parameter init (PyTorch Linear-style uniform bounds).
    bound1 = 1.0 / jnp.sqrt(4 * embed_dim)
    w1 = jax.random.uniform(k_w1, (4 * embed_dim, fusion_hidden_dim),
                            minval=-bound1, maxval=bound1, dtype=jnp.float32)
    b1 = jax.random.uniform(k_b1, (fusion_hidden_dim,),
                            minval=-bound1, maxval=bound1, dtype=jnp.float32)
    bound2 = 1.0 / jnp.sqrt(fusion_hidden_dim)
    w2 = jax.random.uniform(k_w2, (fusion_hidden_dim, fusion_output_dim),
                            minval=-bound2, maxval=bound2, dtype=jnp.float32)
    b2 = jax.random.uniform(k_b2, (fusion_output_dim,),
                            minval=-bound2, maxval=bound2, dtype=jnp.float32)

    def ref_fn(s, d, w1_, b1_, w2_, b2_):
        combined = jnp.concatenate([s, d, s - d, s * d], axis=1)
        h = jnp.maximum(combined @ w1_ + b1_, 0.0)
        return jnp.maximum(h @ w2_ + b2_, 0.0)

    ref = ref_fn(src_emb, dst_emb, w1, b1, w2, b2)

    # 1) f32, merged layer-1 dot (default for small E): exact vs. pure-JAX ref.
    out = jax.block_until_ready(
        link_representation(src_emb, dst_emb, w1, b1, w2, b2))
    assert out.shape == (batch, fusion_output_dim)
    assert jnp.allclose(out, ref, atol=1e-5, rtol=1e-5)

    # 2) Ragged batch (not a multiple of the tile): partial last block, no
    #    wrapper-side padding/slicing passes.
    b_odd = 13
    s2 = jax.random.normal(jax.random.PRNGKey(1), (b_odd, embed_dim), jnp.float32)
    d2 = jax.random.normal(jax.random.PRNGKey(2), (b_odd, embed_dim), jnp.float32)
    out2 = jax.block_until_ready(link_representation(s2, d2, w1, b1, w2, b2))
    assert out2.shape == (b_odd, fusion_output_dim)
    assert jnp.allclose(out2, ref_fn(s2, d2, w1, b1, w2, b2), atol=1e-5, rtol=1e-5)

    # 3) Split-dot layer-1 path (used for large E): still exact.
    out3 = jax.block_until_ready(
        link_representation(src_emb, dst_emb, w1, b1, w2, b2, merge_layer1=False))
    assert jnp.allclose(out3, ref, atol=1e-5, rtol=1e-5)

    # 4) bf16 MXU-operand path (HBM/VMEM optimization), loose tolerance.
    out4 = jax.block_until_ready(
        link_representation(src_emb, dst_emb, w1, b1, w2, b2,
                            matmul_dtype=jnp.bfloat16))
    assert out4.shape == (batch, fusion_output_dim)
    assert jnp.allclose(out4, ref, atol=1e-1, rtol=1e-1)

    # 5) Output width near a 128 multiple -> exercises the (cheap) O-padding branch.
    o_alt = 120
    w2b = jax.random.uniform(jax.random.PRNGKey(3), (fusion_hidden_dim, o_alt),
                             minval=-bound2, maxval=bound2, dtype=jnp.float32)
    b2b = jax.random.uniform(jax.random.PRNGKey(4), (o_alt,),
                             minval=-bound2, maxval=bound2, dtype=jnp.float32)
    out5 = jax.block_until_ready(
        link_representation(src_emb, dst_emb, w1, b1, w2b, b2b))
    assert out5.shape == (batch, o_alt)
    assert jnp.allclose(out5, ref_fn(src_emb, dst_emb, w1, b1, w2b, b2b),
                        atol=1e-5, rtol=1e-5)

    print("KERNEL_OK")
</pallas_src>

<mosaic_0001>
module attributes {stable_mosaic.version = 11 : i64} {
  func.func @_link_rep_kernel_merged(%arg0: i32, %arg1: memref<8x32xf32, #tpu.memory_space<vmem>>, %arg2: memref<8x32xf32, #tpu.memory_space<vmem>>, %arg3: memref<96x128xf32, #tpu.memory_space<vmem>>, %arg4: memref<1x128xf32, #tpu.memory_space<vmem>>, %arg5: memref<128x32xf32, #tpu.memory_space<vmem>>, %arg6: memref<1x32xf32, #tpu.memory_space<vmem>>, %arg7: memref<8x32xf32, #tpu.memory_space<vmem>>) attributes {dimension_semantics = [#tpu.dimension_semantics<parallel>], iteration_bounds = array<i64: 1>, scalar_prefetch = 0 : i64, scratch_operands = 0 : i64, tpu.core_type = #tpu.core_type<tc>, window_params = [{transform_indices = @transform_0, window_bounds = array<i64: 8, 32>}, {transform_indices = @transform_1, window_bounds = array<i64: 8, 32>}, {pipeline_mode = #tpu.pipeline_mode<synchronous>, transform_indices = @transform_2, window_bounds = array<i64: 96, 128>}, {pipeline_mode = #tpu.pipeline_mode<synchronous>, transform_indices = @transform_3, window_bounds = array<i64: 1, 128>}, {pipeline_mode = #tpu.pipeline_mode<synchronous>, transform_indices = @transform_4, window_bounds = array<i64: 128, 32>}, {pipeline_mode = #tpu.pipeline_mode<synchronous>, transform_indices = @transform_5, window_bounds = array<i64: 1, 32>}, {transform_indices = @transform_6, window_bounds = array<i64: 8, 32>}]} {
    %c0 = arith.constant 0 : index
    %c0_0 = arith.constant 0 : index
    %0 = vector.load %arg1[%c0, %c0_0] : memref<8x32xf32, #tpu.memory_space<vmem>>, vector<8x32xf32>
    %c0_1 = arith.constant 0 : index
    %c0_2 = arith.constant 0 : index
    %1 = vector.load %arg2[%c0_1, %c0_2] : memref<8x32xf32, #tpu.memory_space<vmem>>, vector<8x32xf32>
    %c0_3 = arith.constant 0 : index
    %c0_4 = arith.constant 0 : index
    %2 = vector.load %arg3[%c0_3, %c0_4] : memref<96x128xf32, #tpu.memory_space<vmem>>, vector<96x128xf32>
    %c0_5 = arith.constant 0 : index
    %c0_6 = arith.constant 0 : index
    %3 = vector.load %arg5[%c0_5, %c0_6] : memref<128x32xf32, #tpu.memory_space<vmem>>, vector<128x32xf32>
    %4 = arith.mulf %0, %1 : vector<8x32xf32>
    %5 = tpu.concatenate %0, %1, %4 in 1 : vector<8x32xf32>, vector<8x32xf32>, vector<8x32xf32> -> vector<8x96xf32>
    %cst = arith.constant dense<0.000000e+00> : vector<8x128xf32>
    %6 = tpu.matmul %5, %2, %cst {dimension_numbers = #tpu.dot_dimension_numbers<[1], [0], [0], [1], [0, 0, 1, 1], [], []>} : vector<8x96xf32>, vector<96x128xf32>, vector<8x128xf32> -> vector<8x128xf32>
    %c0_7 = arith.constant 0 : index
    %c0_8 = arith.constant 0 : index
    %7 = vector.load %arg4[%c0_7, %c0_8] : memref<1x128xf32, #tpu.memory_space<vmem>>, vector<1x128xf32>
    %8 = vector.broadcast %7 : vector<1x128xf32> to vector<8x128xf32>
    %9 = arith.addf %6, %8 : vector<8x128xf32>
    %cst_9 = arith.constant 0.000000e+00 : f32
    %10 = vector.broadcast %cst_9 : f32 to vector<8x128xf32>
    %11 = arith.maximumf %9, %10 : vector<8x128xf32>
    %cst_10 = arith.constant dense<0.000000e+00> : vector<8x32xf32>
    %12 = tpu.matmul %11, %3, %cst_10 {dimension_numbers = #tpu.dot_dimension_numbers<[1], [0], [0], [1], [0, 0, 1, 1], [], []>} : vector<8x128xf32>, vector<128x32xf32>, vector<8x32xf32> -> vector<8x32xf32>
    %c0_11 = arith.constant 0 : index
    %c0_12 = arith.constant 0 : index
    %13 = vector.load %arg6[%c0_11, %c0_12] : memref<1x32xf32, #tpu.memory_space<vmem>>, vector<1x32xf32>
    %14 = vector.broadcast %13 : vector<1x32xf32> to vector<8x32xf32>
    %15 = arith.addf %12, %14 : vector<8x32xf32>
    %cst_13 = arith.constant 0.000000e+00 : f32
    %16 = vector.broadcast %cst_13 : f32 to vector<8x32xf32>
    %17 = arith.maximumf %15, %16 : vector<8x32xf32>
    %c0_14 = arith.constant 0 : index
    %c0_15 = arith.constant 0 : index
    %18 = vector.load %arg7[%c0_14, %c0_15] : memref<8x32xf32, #tpu.memory_space<vmem>>, vector<8x32xf32>
    tpu.vector_store %arg7[%c0_14, %c0_15], %17 {strides = array<i32>} : memref<8x32xf32, #tpu.memory_space<vmem>>, vector<8x32xf32>,
    return
  }
  func.func @transform_0(%arg0: i32) -> (i32, i32) {
    %c0_i32 = arith.constant 0 : i32
    %c0_i32_0 = arith.constant 0 : i32
    return %arg0, %c0_i32 : i32, i32
  }
  func.func @transform_1(%arg0: i32) -> (i32, i32) {
    %c0_i32 = arith.constant 0 : i32
    %c0_i32_0 = arith.constant 0 : i32
    return %arg0, %c0_i32 : i32, i32
  }
  func.func @transform_2(%arg0: i32) -> (i32, i32) {
    %c0_i32 = arith.constant 0 : i32
    %c0_i32_0 = arith.constant 0 : i32
    %c0_i32_1 = arith.constant 0 : i32
    return %c0_i32, %c0_i32_0 : i32, i32
  }
  func.func @transform_3(%arg0: i32) -> (i32, i32) {
    %c0_i32 = arith.constant 0 : i32
    %c0_i32_0 = arith.constant 0 : i32
    %c0_i32_1 = arith.constant 0 : i32
    return %c0_i32, %c0_i32_0 : i32, i32
  }
  func.func @transform_4(%arg0: i32) -> (i32, i32) {
    %c0_i32 = arith.constant 0 : i32
    %c0_i32_0 = arith.constant 0 : i32
    %c0_i32_1 = arith.constant 0 : i32
    return %c0_i32, %c0_i32_0 : i32, i32
  }
  func.func @transform_5(%arg0: i32) -> (i32, i32) {
    %c0_i32 = arith.constant 0 : i32
    %c0_i32_0 = arith.constant 0 : i32
    %c0_i32_1 = arith.constant 0 : i32
    return %c0_i32, %c0_i32_0 : i32, i32
  }
  func.func @transform_6(%arg0: i32) -> (i32, i32) {
    %c0_i32 = arith.constant 0 : i32
    %c0_i32_0 = arith.constant 0 : i32
    return %arg0, %c0_i32 : i32, i32
  }
}

</mosaic_0001>

<bundles_post_ra>
// kernel: tpu_custom_call.1
= control target key start
LH: loop header
LB: loop body
LE: loop exit
PB: predicated region body
PF: predicated region fallthrough
CT: control target
= control target key end

     0   :  { %s170_s25 = smov 32   ;;  %s309_s0 = inlined_call_operand.vmem [shape: f32[8,32], index: 0, kind: input, shape index: {}]   ;;  %s310_s1 = inlined_call_operand.vmem [shape: f32[8,32], index: 1, kind: input, shape index: {}]   ;;  %s311_s2 = inlined_call_operand.vmem [shape: f32[96,128], index: 2, kind: input, shape index: {}]   ;;  %s312_s3 = inlined_call_operand.vmem [shape: f32[1,128], index: 3, kind: input, shape index: {}]   ;;  %s313_s4 = inlined_call_operand.vmem [shape: f32[128,32], index: 4, kind: input, shape index: {}]   ;;  %s314_s5 = inlined_call_operand.vmem [shape: f32[1,32], index: 5, kind: input, shape index: {}]   ;;  %s315_s6 = inlined_call_operand.hbm [shape: f32[8,32], index: 6, kind: output, shape index: {}]  }
   0x1   :  { %v25_v0 = vld [vmem:[%s310_s1] sm:$0xff]  ;;  %v37_v1 = vld [vmem:[%s311_s2 + $0x58] sm:$0xff]  ;;  %v36_v2 = vld [vmem:[%s311_s2 + $0x50] sm:$0xff] }
   0x2   :  { %56 = vrot.lane.b32.xlu0 %v25_v0, %s170_s25  ;;  %79 = vmatpush.msra.mxu0 %v37_v1  ;;  %v24_v3 = vld [vmem:[%s309_s0] sm:$0xff]  ;;  %v35_v4 = vld [vmem:[%s311_s2 + $0x48] sm:$0xff] }
   0x4   :  { %80 = vmatpush.msra.mxu0 %v36_v2 }
   0x5   :  { %11 = vsyncpa [#allocation3], 0  ;;  %v34_v5 = vld [vmem:[%s311_s2 + $0x40] sm:$0xff]  ;;  %v54_v6 = vmul.f32 %v25_v0, %v24_v3  ;;  %v33_v7 = vld [vmem:[%s311_s2 + $0x38] sm:$0xff]  ;;  %s171_s0 = smov 64   ;;  %vm63_vm0 = vcmask 261120  }
   0x6   :  { %81 = vmatpush.msra.mxu0 %v35_v4  ;;  %v32_v8 = vld [vmem:[%s311_s2 + $0x30] sm:$0xff]  ;;  %v31_v9 = vld [vmem:[%s311_s2 + $0x28] sm:$0xff]  ;;  %v30_v10 = vld [vmem:[%s311_s2 + $0x20] sm:$0xff]  ;;  %vm65_vm1 = vcmask 523264   ;;  %vm71_vm2 = vcmask 785408   ;;  %s172_s8 = smov [#allocation2]  }
   0x7   :  { %v29_v11 = vld [vmem:[%s311_s2 + $0x18] sm:$0xff]  ;;  %v28_v12 = vld [vmem:[%s311_s2 + $0x10] sm:$0xff]  ;;  %v27_v13 = vld [vmem:[%s311_s2 + $0x8] sm:$0xff]  ;;  %s127_s9 = sshll.u32 %s172_s8, 4  ;;  %s128_s9 = int_to_ptr.vmem [resolvable:$true] %s127_s9 }
   0x8   :  { %82 = vmatpush.msra.mxu0 %v34_v5  ;;  %v26_v14 = vld [vmem:[%s311_s2] sm:$0xff]  ;;  %v53_v15 = vld [vmem:[%s313_s4 + $0x78] sm:$0xff]  ;;  %v52_v16 = vld [vmem:[%s313_s4 + $0x70] sm:$0xff] }
   0x9   :  { %100 = vmatpush.msra.mxu1 %v53_v15  ;;  %v51_v17 = vld [vmem:[%s313_s4 + $0x68] sm:$0xff]  ;;  %v50_v18 = vld [vmem:[%s313_s4 + $0x60] sm:$0xff]  ;;  %v49_v19 = vld [vmem:[%s313_s4 + $0x58] sm:$0xff] }
   0xa   :  { %60 = vrot.lane.b32.xlu0 %v54_v6, %s171_s0  ;;  %83 = vmatpush.msra.mxu0 %v33_v7  ;;  %v48_v20 = vld [vmem:[%s313_s4 + $0x50] sm:$0xff]  ;;  %v47_v21 = vld [vmem:[%s313_s4 + $0x48] sm:$0xff]  ;;  %v46_v22 = vld [vmem:[%s313_s4 + $0x40] sm:$0xff] }
   0xb   :  { %101 = vmatpush.msra.mxu1 %v52_v16  ;;  %v45_v23 = vld [vmem:[%s313_s4 + $0x38] sm:$0xff]  ;;  %v44_v24 = vld [vmem:[%s313_s4 + $0x30] sm:$0xff]  ;;  %v43_v25 = vld [vmem:[%s313_s4 + $0x28] sm:$0xff] }
   0xc   :  { %84 = vmatpush.msra.mxu0 %v32_v8  ;;  %v42_v26 = vld [vmem:[%s313_s4 + $0x20] sm:$0xff]  ;;  %v41_v28 = vld [vmem:[%s313_s4 + $0x18] sm:$0xff]  ;;  %v40_v32 = vld [vmem:[%s313_s4 + $0x10] sm:$0xff] }
   0xd   :  { %102 = vmatpush.msra.mxu1 %v51_v17  ;;  %v39_v33 = vld [vmem:[%s313_s4 + $0x8] sm:$0xff]  ;;  %v38_v34 = vld [vmem:[%s313_s4] sm:$0xff]  ;;  %s129_s4 = sshll.u32 %s315_s6, 4  ;;  %s130_s4 = int_to_ptr.hbm [resolvable:$true] %s129_s4 }
   0xe   :  { %85 = vmatpush.msra.mxu0 %v31_v9  ;;  %v142_v35 = vld [vmem:[%s312_s3] ss:$0 sm:$0xff] }
   0xf   :  { %103 = vmatpush.msra.mxu1 %v50_v18  ;;  %v143_v39 = vld [vmem:[%s314_s5] ss:$0 sm:$0xff] }
  0x10   :  { %86 = vmatpush.msra.mxu0 %v30_v10 }
  0x11   :  { %104 = vmatpush.msra.mxu1 %v49_v19 }
  0x12   :  { %87 = vmatpush.msra.mxu0 %v29_v11 }
  0x13   :  { %105 = vmatpush.msra.mxu1 %v48_v20 }
  0x14   :  { %88 = vmatpush.msra.mxu0 %v28_v12 }
  0x15   :  { %106 = vmatpush.msra.mxu1 %v47_v21 }
  0x16   :  { %89 = vmatpush.msra.mxu0 %v27_v13 }
  0x17   :  { %107 = vmatpush.msra.mxu1 %v46_v22 }
  0x18   :  { %90 = vmatpush.msra.mxu0 %v26_v14 }
  0x19   :  { %108 = vmatpush.msra.mxu1 %v45_v23 }
  0x1b   :  { %109 = vmatpush.msra.mxu1 %v44_v24 }
  0x1d   :  { %110 = vmatpush.msra.mxu1 %v43_v25 }
  0x1f   :  { %111 = vmatpush.msra.mxu1 %v42_v26 }
  0x21   :  { %112 = vmatpush.msra.mxu1 %v41_v28 }
  0x23   :  { %113 = vmatpush.msra.mxu1 %v40_v32 }
  0x25   :  { %114 = vmatpush.msra.mxu1 %v39_v33 }
  0x27   :  { %115 = vmatpush.msra.mxu1 %v38_v34 }
  0x74   :  { %v57_v27 = vpop.permute.xlu0 %56 }
  0x75   :  { %v64_v29 = vsel %vm63_vm0, %v24_v3, %v57_v27 }
  0x7c   :  { %v61_v30 = vpop.permute.xlu0 %60 }
  0x7d   :  { %v66_v31 = vsel %vm65_vm1, %v64_v29, %v61_v30 }
  0x7e   :  { %138 = vmatmul.msk.f32.vlgmr.msra.gmra.mxu0 %vm71_vm2, %v66_v31 }
  0xfb   :  { %v92_v36 = vpop.f32.mrf.mxu0 }
  0xfc   :  { %v93_v37 = vadd.f32 %v142_v35, %v92_v36 }
  0xfe   :  { %v95_v38 = vmax.f32 %v93_v37, 0.0 }
 0x100   :  { %116 = vmatmul.f32.vlgmr.msra.gmra.mxu1 %v95_v38 }
 0x17d   :  { %v117_v40 = vpop.f32.mrf.mxu1 }
 0x17e   :  { %v118_v41 = vadd.f32 %v143_v39, %v117_v40 }
 0x180   :  { %v120_v42 = vmax.f32 %v118_v41, 0.0 }
 0x182   :  { %121 = vst.msk [vmem:[#allocation2] sm:$0xff] %vm63_vm0, %v120_v42 }
 0x183   :  { %132 = dma.vmem_to_hbm [thread:$0]  %s128_s9, 128, %s130_s4, [#allocation3]  }
 0x184   :  { %168 = dma.done.wait [#allocation3], 128  }
 0x185   :  { %169 = vsyncadd [#allocation3], 4294967168 }
 0x186   :  { %137 = vsyncpa [#allocation3], 1 }

</bundles_post_ra>
